<compile_context>
chip_gen: v5e
topology: v5e:2x2
jax: 0.10.0
libtpu: 0.0.40
codegen_flags: <defaults>
</compile_context>

<pallas_src>
import jax
import jax.numpy as jnp
from jax.experimental import pallas as pl
from jax.experimental.pallas import tpu as pltpu

HIDDEN = 256


def _round_up(x, m):
    return (x + m - 1) // m * m


def _qnet_kernel(x_ref, a_ref, w1x_ref, w1a_ref, b1_ref,
                 w2_ref, b2_ref, w3_ref, b3_ref, out_ref):
    # Layer 1: split matmul == concat([x, a]) @ W1, plus bias and ReLU.
    h1 = jnp.dot(x_ref[...], w1x_ref[...], preferred_element_type=jnp.float32)
    h1 = h1 + jnp.dot(a_ref[...], w1a_ref[...], preferred_element_type=jnp.float32)
    h1 = jnp.maximum(h1 + b1_ref[...], 0.0)
    # Layer 2
    h2 = jnp.dot(h1, w2_ref[...], preferred_element_type=jnp.float32) + b2_ref[...]
    h2 = jnp.maximum(h2, 0.0)
    # Layer 3 (no activation)
    out_ref[...] = (
        jnp.dot(h2, w3_ref[...], preferred_element_type=jnp.float32) + b3_ref[...]
    )


def qnetwork_forward(x, a, params, block_b=256):
    """x: (B, obs_dim) f32, a: (B, act_dim) f32 -> (B, 1) f32."""
    w1x, w1a, b1, w2, b2, w3, b3 = params
    x = x.astype(jnp.float32)
    a = a.astype(jnp.float32)

    B, obs_dim = x.shape
    act_dim = a.shape[1]

    # Batch tile: multiple of 8 (sublane), capped at block_b; pad batch to a
    # multiple of the tile so every grid step sees a full block.
    bm = min(block_b, _round_up(B, 8))
    b_pad = _round_up(B, bm)
    if b_pad != B:
        x = jnp.pad(x, ((0, b_pad - B), (0, 0)))
        a = jnp.pad(a, ((0, b_pad - B), (0, 0)))

    grid = (b_pad // bm,)

    d_in = obs_dim + act_dim
    flops = 2 * b_pad * (d_in * HIDDEN + HIDDEN * HIDDEN + HIDDEN * 1)
    bytes_accessed = 4 * (
        b_pad * (obs_dim + act_dim + 1)
        + d_in * HIDDEN + HIDDEN + HIDDEN * HIDDEN + HIDDEN + HIDDEN + 1
    )

    out = pl.pallas_call(
        _qnet_kernel,
        out_shape=jax.ShapeDtypeStruct((b_pad, 1), jnp.float32),
        grid=grid,
        in_specs=[
            pl.BlockSpec((bm, obs_dim), lambda i: (i, 0)),        # x tile
            pl.BlockSpec((bm, act_dim), lambda i: (i, 0)),        # a tile
            pl.BlockSpec((obs_dim, HIDDEN), lambda i: (0, 0)),    # W1_obs (resident)
            pl.BlockSpec((act_dim, HIDDEN), lambda i: (0, 0)),    # W1_act (resident)
            pl.BlockSpec((1, HIDDEN), lambda i: (0, 0)),          # b1
            pl.BlockSpec((HIDDEN, HIDDEN), lambda i: (0, 0)),     # W2 (resident)
            pl.BlockSpec((1, HIDDEN), lambda i: (0, 0)),          # b2
            pl.BlockSpec((HIDDEN, 1), lambda i: (0, 0)),          # W3
            pl.BlockSpec((1, 1), lambda i: (0, 0)),               # b3
        ],
        out_specs=pl.BlockSpec((bm, 1), lambda i: (i, 0)),
        compiler_params=pltpu.CompilerParams(
            dimension_semantics=("parallel",),
        ),
        cost_estimate=pl.CostEstimate(
            flops=flops, transcendentals=0, bytes_accessed=bytes_accessed
        ),
    )(x, a, w1x, w1a, b1, w2, b2, w3, b3)

    return out[:B]


def init_params(key, obs_dim, act_dim):
    """Init mimicking nn.Linear default: U(-1/sqrt(fan_in), 1/sqrt(fan_in)).
    W1 is stored split into (obs_dim, 256) and (act_dim, 256) halves; all
    weights are (in_features, out_features); biases are (1, out_features)."""
    d_in = obs_dim + act_dim
    ks = jax.random.split(key, 6)

    def lin(kw, kb, fan_in, fan_out):
        bound = 1.0 / jnp.sqrt(jnp.float32(fan_in))
        w = jax.random.uniform(kw, (fan_in, fan_out), jnp.float32, -bound, bound)
        b = jax.random.uniform(kb, (1, fan_out), jnp.float32, -bound, bound)
        return w, b

    w1, b1 = lin(ks[0], ks[1], d_in, HIDDEN)
    w2, b2 = lin(ks[2], ks[3], HIDDEN, HIDDEN)
    w3, b3 = lin(ks[4], ks[5], HIDDEN, 1)
    w1x, w1a = w1[:obs_dim], w1[obs_dim:]
    return (w1x, w1a, b1, w2, b2, w3, b3)


if __name__ == "__main__":
    key = jax.random.PRNGKey(0)
    k_x, k_a, k_p = jax.random.split(key, 3)

    batch, obs_dim, act_dim = 8, 17, 6
    x = jax.random.normal(k_x, (batch, obs_dim), jnp.float32)
    a = jax.random.normal(k_a, (batch, act_dim), jnp.float32)
    params = init_params(k_p, obs_dim, act_dim)

    q = qnetwork_forward(x, a, params)
    jax.block_until_ready(q)

    # Reference check in plain JAX (concat formulation, identical math).
    w1x, w1a, b1, w2, b2, w3, b3 = params
    w1 = jnp.concatenate([w1x, w1a], axis=0)
    xa = jnp.concatenate([x, a], axis=1)
    ref = jnp.maximum(xa @ w1 + b1, 0.0)
    ref = jnp.maximum(ref @ w2 + b2, 0.0)
    ref = ref @ w3 + b3

    assert q.shape == (batch, 1)
    assert jnp.allclose(q, ref, atol=1e-4, rtol=1e-4)

    print("KERNEL_OK")
</pallas_src>

<mosaic_0001>
module attributes {stable_mosaic.version = 11 : i64} {
  func.func @_qnet_kernel(%arg0: i32, %arg1: memref<8x17xf32, #tpu.memory_space<vmem>>, %arg2: memref<8x6xf32, #tpu.memory_space<vmem>>, %arg3: memref<17x256xf32, #tpu.memory_space<vmem>>, %arg4: memref<6x256xf32, #tpu.memory_space<vmem>>, %arg5: memref<1x256xf32, #tpu.memory_space<vmem>>, %arg6: memref<256x256xf32, #tpu.memory_space<vmem>>, %arg7: memref<1x256xf32, #tpu.memory_space<vmem>>, %arg8: memref<256x1xf32, #tpu.memory_space<vmem>>, %arg9: memref<1x1xf32, #tpu.memory_space<vmem>>, %arg10: memref<8x1xf32, #tpu.memory_space<vmem>>) attributes {dimension_semantics = [#tpu.dimension_semantics<parallel>], iteration_bounds = array<i64: 1>, scalar_prefetch = 0 : i64, scratch_operands = 0 : i64, tpu.core_type = #tpu.core_type<tc>, window_params = [{transform_indices = @transform_0, window_bounds = array<i64: 8, 17>}, {transform_indices = @transform_1, window_bounds = array<i64: 8, 6>}, {pipeline_mode = #tpu.pipeline_mode<synchronous>, transform_indices = @transform_2, window_bounds = array<i64: 17, 256>}, {pipeline_mode = #tpu.pipeline_mode<synchronous>, transform_indices = @transform_3, window_bounds = array<i64: 6, 256>}, {pipeline_mode = #tpu.pipeline_mode<synchronous>, transform_indices = @transform_4, window_bounds = array<i64: 1, 256>}, {pipeline_mode = #tpu.pipeline_mode<synchronous>, transform_indices = @transform_5, window_bounds = array<i64: 256, 256>}, {pipeline_mode = #tpu.pipeline_mode<synchronous>, transform_indices = @transform_6, window_bounds = array<i64: 1, 256>}, {pipeline_mode = #tpu.pipeline_mode<synchronous>, transform_indices = @transform_7, window_bounds = array<i64: 256, 1>}, {pipeline_mode = #tpu.pipeline_mode<synchronous>, transform_indices = @transform_8, window_bounds = array<i64: 1, 1>}, {transform_indices = @transform_9, window_bounds = array<i64: 8, 1>}]} {
    %c0 = arith.constant 0 : index
    %c0_0 = arith.constant 0 : index
    %0 = vector.load %arg1[%c0, %c0_0] : memref<8x17xf32, #tpu.memory_space<vmem>>, vector<8x17xf32>
    %c0_1 = arith.constant 0 : index
    %c0_2 = arith.constant 0 : index
    %1 = vector.load %arg3[%c0_1, %c0_2] : memref<17x256xf32, #tpu.memory_space<vmem>>, vector<17x256xf32>
    %cst = arith.constant dense<0.000000e+00> : vector<8x256xf32>
    %2 = tpu.matmul %0, %1, %cst {dimension_numbers = #tpu.dot_dimension_numbers<[1], [0], [0], [1], [0, 0, 1, 1], [], []>} : vector<8x17xf32>, vector<17x256xf32>, vector<8x256xf32> -> vector<8x256xf32>
    %c0_3 = arith.constant 0 : index
    %c0_4 = arith.constant 0 : index
    %3 = vector.load %arg2[%c0_3, %c0_4] : memref<8x6xf32, #tpu.memory_space<vmem>>, vector<8x6xf32>
    %c0_5 = arith.constant 0 : index
    %c0_6 = arith.constant 0 : index
    %4 = vector.load %arg4[%c0_5, %c0_6] : memref<6x256xf32, #tpu.memory_space<vmem>>, vector<6x256xf32>
    %cst_7 = arith.constant dense<0.000000e+00> : vector<8x256xf32>
    %5 = tpu.matmul %3, %4, %cst_7 {dimension_numbers = #tpu.dot_dimension_numbers<[1], [0], [0], [1], [0, 0, 1, 1], [], []>} : vector<8x6xf32>, vector<6x256xf32>, vector<8x256xf32> -> vector<8x256xf32>
    %6 = arith.addf %2, %5 : vector<8x256xf32>
    %c0_8 = arith.constant 0 : index
    %c0_9 = arith.constant 0 : index
    %7 = vector.load %arg5[%c0_8, %c0_9] : memref<1x256xf32, #tpu.memory_space<vmem>>, vector<1x256xf32>
    %8 = vector.broadcast %7 : vector<1x256xf32> to vector<8x256xf32>
    %9 = arith.addf %6, %8 : vector<8x256xf32>
    %cst_10 = arith.constant 0.000000e+00 : f32
    %10 = vector.broadcast %cst_10 : f32 to vector<8x256xf32>
    %11 = arith.maximumf %9, %10 : vector<8x256xf32>
    %c0_11 = arith.constant 0 : index
    %c0_12 = arith.constant 0 : index
    %12 = vector.load %arg6[%c0_11, %c0_12] : memref<256x256xf32, #tpu.memory_space<vmem>>, vector<256x256xf32>
    %cst_13 = arith.constant dense<0.000000e+00> : vector<8x256xf32>
    %13 = tpu.matmul %11, %12, %cst_13 {dimension_numbers = #tpu.dot_dimension_numbers<[1], [0], [0], [1], [0, 0, 1, 1], [], []>} : vector<8x256xf32>, vector<256x256xf32>, vector<8x256xf32> -> vector<8x256xf32>
    %c0_14 = arith.constant 0 : index
    %c0_15 = arith.constant 0 : index
    %14 = vector.load %arg7[%c0_14, %c0_15] : memref<1x256xf32, #tpu.memory_space<vmem>>, vector<1x256xf32>
    %15 = vector.broadcast %14 : vector<1x256xf32> to vector<8x256xf32>
    %16 = arith.addf %13, %15 : vector<8x256xf32>
    %cst_16 = arith.constant 0.000000e+00 : f32
    %17 = vector.broadcast %cst_16 : f32 to vector<8x256xf32>
    %18 = arith.maximumf %16, %17 : vector<8x256xf32>
    %c0_17 = arith.constant 0 : index
    %c0_18 = arith.constant 0 : index
    %19 = vector.load %arg8[%c0_17, %c0_18] : memref<256x1xf32, #tpu.memory_space<vmem>>, vector<256x1xf32>
    %cst_19 = arith.constant dense<0.000000e+00> : vector<8x1xf32>
    %20 = tpu.matmul %18, %19, %cst_19 {dimension_numbers = #tpu.dot_dimension_numbers<[1], [0], [0], [1], [0, 0, 1, 1], [], []>} : vector<8x256xf32>, vector<256x1xf32>, vector<8x1xf32> -> vector<8x1xf32>
    %c0_20 = arith.constant 0 : index
    %c0_21 = arith.constant 0 : index
    %21 = vector.load %arg9[%c0_20, %c0_21] : memref<1x1xf32, #tpu.memory_space<vmem>>, vector<1x1xf32>
    %22 = vector.broadcast %21 : vector<1x1xf32> to vector<8x1xf32>
    %23 = arith.addf %20, %22 : vector<8x1xf32>
    %c0_22 = arith.constant 0 : index
    %c0_23 = arith.constant 0 : index
    %24 = vector.load %arg10[%c0_22, %c0_23] : memref<8x1xf32, #tpu.memory_space<vmem>>, vector<8x1xf32>
    tpu.vector_store %arg10[%c0_22, %c0_23], %23 {strides = array<i32>} : memref<8x1xf32, #tpu.memory_space<vmem>>, vector<8x1xf32>,
    return
  }
  func.func @transform_0(%arg0: i32) -> (i32, i32) {
    %c0_i32 = arith.constant 0 : i32
    %c0_i32_0 = arith.constant 0 : i32
    return %arg0, %c0_i32 : i32, i32
  }
  func.func @transform_1(%arg0: i32) -> (i32, i32) {
    %c0_i32 = arith.constant 0 : i32
    %c0_i32_0 = arith.constant 0 : i32
    return %arg0, %c0_i32 : i32, i32
  }
  func.func @transform_2(%arg0: i32) -> (i32, i32) {
    %c0_i32 = arith.constant 0 : i32
    %c0_i32_0 = arith.constant 0 : i32
    %c0_i32_1 = arith.constant 0 : i32
    return %c0_i32, %c0_i32_0 : i32, i32
  }
  func.func @transform_3(%arg0: i32) -> (i32, i32) {
    %c0_i32 = arith.constant 0 : i32
    %c0_i32_0 = arith.constant 0 : i32
    %c0_i32_1 = arith.constant 0 : i32
    return %c0_i32, %c0_i32_0 : i32, i32
  }
  func.func @transform_4(%arg0: i32) -> (i32, i32) {
    %c0_i32 = arith.constant 0 : i32
    %c0_i32_0 = arith.constant 0 : i32
    %c0_i32_1 = arith.constant 0 : i32
    return %c0_i32, %c0_i32_0 : i32, i32
  }
  func.func @transform_5(%arg0: i32) -> (i32, i32) {
    %c0_i32 = arith.constant 0 : i32
    %c0_i32_0 = arith.constant 0 : i32
    %c0_i32_1 = arith.constant 0 : i32
    return %c0_i32, %c0_i32_0 : i32, i32
  }
  func.func @transform_6(%arg0: i32) -> (i32, i32) {
    %c0_i32 = arith.constant 0 : i32
    %c0_i32_0 = arith.constant 0 : i32
    %c0_i32_1 = arith.constant 0 : i32
    return %c0_i32, %c0_i32_0 : i32, i32
  }
  func.func @transform_7(%arg0: i32) -> (i32, i32) {
    %c0_i32 = arith.constant 0 : i32
    %c0_i32_0 = arith.constant 0 : i32
    %c0_i32_1 = arith.constant 0 : i32
    return %c0_i32, %c0_i32_0 : i32, i32
  }
  func.func @transform_8(%arg0: i32) -> (i32, i32) {
    %c0_i32 = arith.constant 0 : i32
    %c0_i32_0 = arith.constant 0 : i32
    %c0_i32_1 = arith.constant 0 : i32
    return %c0_i32, %c0_i32_0 : i32, i32
  }
  func.func @transform_9(%arg0: i32) -> (i32, i32) {
    %c0_i32 = arith.constant 0 : i32
    %c0_i32_0 = arith.constant 0 : i32
    return %arg0, %c0_i32 : i32, i32
  }
}

</mosaic_0001>

<bundles_post_ra>
// kernel: tpu_custom_call.1
= control target key start
LH: loop header
LB: loop body
LE: loop exit
PB: predicated region body
PF: predicated region fallthrough
CT: control target
= control target key end

     0   :  { %s639_s0 = inlined_call_operand.vmem [shape: f32[8,17], index: 0, kind: input, shape index: {}]   ;;  %s640_s1 = inlined_call_operand.vmem [shape: f32[8,6], index: 1, kind: input, shape index: {}]   ;;  %s641_s2 = inlined_call_operand.vmem [shape: f32[17,256], index: 2, kind: input, shape index: {}]   ;;  %s642_s3 = inlined_call_operand.vmem [shape: f32[6,256], index: 3, kind: input, shape index: {}]   ;;  %s643_s4 = inlined_call_operand.vmem [shape: f32[1,256], index: 4, kind: input, shape index: {}]   ;;  %s644_s5 = inlined_call_operand.hbm [shape: f32[256,256], index: 5, kind: input, shape index: {}]   ;;  %s645_s6 = inlined_call_operand.vmem [shape: f32[1,256], index: 6, kind: input, shape index: {}]   ;;  %s646_s7 = inlined_call_operand.vmem [shape: f32[256,1], index: 7, kind: input, shape index: {}]   ;;  %s647_s8 = inlined_call_operand.<no memory space> [shape: f32[1,1], index: 8, kind: input, shape index: {}]   ;;  %s648_s9 = inlined_call_operand.vmem [shape: f32[8,1], index: 9, kind: output, shape index: {}]  }
   0x1   :  { %v14_v0 = vstv %s647_s8 }
   0x2   :  { %15 = vst [vmem:[#allocation2] sm:$0x1] %v14_v0 }
   0x3   :  { %16 = vsyncpa [#allocation4], 0  ;;  %s31_s13 = sshll.u32 %s644_s5, 4  ;;  %s445_s14 = smov [#allocation3]   ;;  %s32_s13 = int_to_ptr.hbm [resolvable:$true] %s31_s13 }
   0x4   :  { %s33_s15 = sshll.u32 %s445_s14, 4  ;;  %s446_s16 = smov 256   ;;  %s34_s15 = int_to_ptr.vmem [resolvable:$true] %s33_s15 }
   0x5   :  { %s447_s17 = smov 16  }
   0x6   :  { %39 = dma.hbm_to_vmem [thread:$0]  %s32_s13, 8192, %s34_s15, [#allocation4], %s446_s16, %s446_s16, %s447_s17  }
   0x7   :  { %443 = dma.done.wait [#allocation4], 8192  }
   0x8   :  { %444 = vsyncadd [#allocation4], 4294959104  ;;  %vm64_vm0 = vcmask 1045504   ;;  %vm60_vm1 = vcmask 48128   ;;  %v58_v1 = vld [vmem:[%s642_s3] sm:$0x3f] }
   0x9   :  { %v59_v2 = vld [vmem:[%s642_s3 + $0x8] sm:$0x3f]  ;;  %v57_v3 = vld [vmem:[%s640_s1] sm:$0xff]  ;;  %vm115_vm2 = vcmask 1040384   ;;  %407 = vmatpush.msk.msra.mxu2 %vm64_vm0, %v58_v1  ;;  %v53_v6 = vld [vmem:[%s641_s2 + $0x10] sm:$0xff]  ;;  %vm111_vm3 = vcmask 138240  }
   0xa   :  { %409 = vmatpush.msk.msra.mxu3 %vm64_vm0, %v59_v2  ;;  %v55_v4 = vld [vmem:[%s641_s2 + $0x20] sm:$0x1]  ;;  %v56_v5 = vld [vmem:[%s641_s2 + $0x28] sm:$0x1]  ;;  %408 = vmatmul.msk.f32.vlgmr.msra.gmra.mxu2 %vm60_vm1, %v57_v3  ;;  %v54_v7 = vld [vmem:[%s641_s2 + $0x18] sm:$0xff]  ;;  %vm400_vm4 = vcmask 7168  }
   0xb   :  { %410 = vmatmul.msk.f32.vlgmr.msra.gmra.mxu3 %vm60_vm1, %v57_v3  ;;  %411 = vmatpush.msk.msrb.mxu2 %vm115_vm2, %v55_v4  ;;  %v202_v8 = vld [vmem:[#allocation3 + $0xf0] sm:$0xff]  ;;  %v51_v10 = vld [vmem:[%s641_s2] sm:$0xff]  ;;  %v52_v11 = vld [vmem:[%s641_s2 + $0x8] sm:$0xff] }
   0xc   :  { %413 = vmatpush.msk.msrb.mxu3 %vm115_vm2, %v56_v5  ;;  %v234_v9 = vld [vmem:[#allocation3 + $0x1f0] sm:$0xff]  ;;  %242 = vmatpush.msra.mxu0 %v202_v8  ;;  %v200_v12 = vld [vmem:[#allocation3 + $0xe0] sm:$0xff]  ;;  %v203_v13 = vld [vmem:[#allocation3 + $0xf8] sm:$0xff] }
   0xd   :  { %262 = vmatpush.msra.mxu1 %v234_v9  ;;  %136 = vmatpush.msrb.mxu2 %v53_v6  ;;  %v235_v14 = vld [vmem:[#allocation3 + $0x1f8] sm:$0xff]  ;;  %v232_v15 = vld [vmem:[#allocation3 + $0x1e0] sm:$0xff]  ;;  %v198_v16 = vld [vmem:[#allocation3 + $0xd0] sm:$0xff] }
   0xe   :  { %156 = vmatpush.msrb.mxu3 %v54_v7  ;;  %243 = vmatpush.msra.mxu0 %v200_v12  ;;  %v230_v17 = vld [vmem:[#allocation3 + $0x1d0] sm:$0xff]  ;;  %v50_v18 = vld [vmem:[%s639_s0] sm:$0xff]  ;;  %v201_v19 = vld [vmem:[#allocation3 + $0xe8] sm:$0xff] }
   0xf   :  { %263 = vmatpush.msra.mxu1 %v232_v15  ;;  %137 = vmatpush.msrb.mxu2 %v51_v10  ;;  %v233_v20 = vld [vmem:[#allocation3 + $0x1e8] sm:$0xff]  ;;  %v196_v21 = vld [vmem:[#allocation3 + $0xc0] sm:$0xff]  ;;  %v199_v23 = vld [vmem:[#allocation3 + $0xd8] sm:$0xff] }
  0x10   :  { %157 = vmatpush.msrb.mxu3 %v52_v11  ;;  %244 = vmatpush.msra.mxu0 %v198_v16  ;;  %v228_v22 = vld [vmem:[#allocation3 + $0x1c0] sm:$0xff]  ;;  %v231_v24 = vld [vmem:[#allocation3 + $0x1d8] sm:$0xff]  ;;  %v194_v25 = vld [vmem:[#allocation3 + $0xb0] sm:$0xff] }
  0x11   :  { %282 = vmatpush.msra.mxu2 %v203_v13  ;;  %264 = vmatpush.msra.mxu1 %v230_v17  ;;  %v226_v26 = vld [vmem:[#allocation3 + $0x1b0] sm:$0xff]  ;;  %v197_v27 = vld [vmem:[#allocation3 + $0xc8] sm:$0xff]  ;;  %v192_v29 = vld [vmem:[#allocation3 + $0xa0] sm:$0xff] }
  0x12   :  { %302 = vmatpush.msra.mxu3 %v235_v14  ;;  %412 = vmatmul.msk.f32.vlgmr.msrb.gmra.mxu2 %vm111_vm3, %v50_v18  ;;  %v229_v28 = vld [vmem:[#allocation3 + $0x1c8] sm:$0xff]  ;;  %v224_v30 = vld [vmem:[#allocation3 + $0x1a0] sm:$0xff]  ;;  %v195_v31 = vld [vmem:[#allocation3 + $0xb8] sm:$0xff] }
  0x13   :  { %414 = vmatmul.msk.f32.vlgmr.msrb.gmra.mxu3 %vm111_vm3, %v50_v18  ;;  %283 = vmatpush.msra.mxu2 %v201_v19  ;;  %v227_v32 = vld [vmem:[#allocation3 + $0x1b8] sm:$0xff]  ;;  %v190_v33 = vld [vmem:[#allocation3 + $0x90] sm:$0xff]  ;;  %v193_v35 = vld [vmem:[#allocation3 + $0xa8] sm:$0xff] }
  0x14   :  { %303 = vmatpush.msra.mxu3 %v233_v20  ;;  %245 = vmatpush.msra.mxu0 %v196_v21  ;;  %v222_v34 = vld [vmem:[#allocation3 + $0x190] sm:$0xff]  ;;  %v225_v36 = vld [vmem:[#allocation3 + $0x1a8] sm:$0xff]  ;;  %v188_v37 = vld [vmem:[#allocation3 + $0x80] sm:$0xff] }
  0x15   :  { %265 = vmatpush.msra.mxu1 %v228_v22  ;;  %284 = vmatpush.msra.mxu2 %v199_v23  ;;  %v220_v38 = vld [vmem:[#allocation3 + $0x180] sm:$0xff]  ;;  %v191_v39 = vld [vmem:[#allocation3 + $0x98] sm:$0xff]  ;;  %v189_v41 = vld [vmem:[#allocation3 + $0x88] sm:$0xff] }
  0x16   :  { %304 = vmatpush.msra.mxu3 %v231_v24  ;;  %246 = vmatpush.msra.mxu0 %v194_v25  ;;  %v223_v40 = vld [vmem:[#allocation3 + $0x198] sm:$0xff]  ;;  %v221_v42 = vld [vmem:[#allocation3 + $0x188] sm:$0xff]  ;;  %v186_v43 = vld [vmem:[#allocation3 + $0x70] sm:$0xff] }
  0x17   :  { %266 = vmatpush.msra.mxu1 %v226_v26  ;;  %285 = vmatpush.msra.mxu2 %v197_v27  ;;  %v218_v44 = vld [vmem:[#allocation3 + $0x170] sm:$0xff]  ;;  %v187_v45 = vld [vmem:[#allocation3 + $0x78] sm:$0xff]  ;;  %v184_v47 = vld [vmem:[#allocation3 + $0x60] sm:$0xff] }
  0x18   :  { %305 = vmatpush.msra.mxu3 %v229_v28  ;;  %247 = vmatpush.msra.mxu0 %v192_v29  ;;  %v219_v46 = vld [vmem:[#allocation3 + $0x178] sm:$0xff]  ;;  %v216_v48 = vld [vmem:[#allocation3 + $0x160] sm:$0xff]  ;;  %v185_v49 = vld [vmem:[#allocation3 + $0x68] sm:$0xff] }
  0x19   :  { %267 = vmatpush.msra.mxu1 %v224_v30  ;;  %286 = vmatpush.msra.mxu2 %v195_v31  ;;  %v217_v50 = vld [vmem:[#allocation3 + $0x168] sm:$0xff]  ;;  %v182_v51 = vld [vmem:[#allocation3 + $0x50] sm:$0xff]  ;;  %v183_v53 = vld [vmem:[#allocation3 + $0x58] sm:$0xff] }
  0x1a   :  { %306 = vmatpush.msra.mxu3 %v227_v32  ;;  %248 = vmatpush.msra.mxu0 %v190_v33  ;;  %v214_v52 = vld [vmem:[#allocation3 + $0x150] sm:$0xff]  ;;  %v215_v54 = vld [vmem:[#allocation3 + $0x158] sm:$0xff]  ;;  %v180_v55 = vld [vmem:[#allocation3 + $0x40] sm:$0xff] }
  0x1b   :  { %268 = vmatpush.msra.mxu1 %v222_v34  ;;  %287 = vmatpush.msra.mxu2 %v193_v35  ;;  %v212_v56 = vld [vmem:[#allocation3 + $0x140] sm:$0xff]  ;;  %v181_v57 = vld [vmem:[#allocation3 + $0x48] sm:$0xff]  ;;  %v178_v59 = vld [vmem:[#allocation3 + $0x30] sm:$0xff] }
  0x1c   :  { %307 = vmatpush.msra.mxu3 %v225_v36  ;;  %249 = vmatpush.msra.mxu0 %v188_v37  ;;  %v213_v58 = vld [vmem:[#allocation3 + $0x148] sm:$0xff]  ;;  %v210_v60 = vld [vmem:[#allocation3 + $0x130] sm:$0xff]  ;;  %v179_v61 = vld [vmem:[#allocation3 + $0x38] sm:$0xff] }
  0x1d   :  { %269 = vmatpush.msra.mxu1 %v220_v38  ;;  %288 = vmatpush.msra.mxu2 %v191_v39  ;;  %v211_v62 = vld [vmem:[#allocation3 + $0x138] sm:$0xff]  ;;  %v176_v63 = vld [vmem:[#allocation3 + $0x20] sm:$0xff]  ;;  %v177_v1 = vld [vmem:[#allocation3 + $0x28] sm:$0xff] }
  0x1e   :  { %308 = vmatpush.msra.mxu3 %v223_v40  ;;  %250 = vmatpush.msra.mxu0 %v186_v43  ;;  %v208_v0 = vld [vmem:[#allocation3 + $0x120] sm:$0xff]  ;;  %v209_v2 = vld [vmem:[#allocation3 + $0x128] sm:$0xff]  ;;  %v174_v3 = vld [vmem:[#allocation3 + $0x10] sm:$0xff] }
  0x1f   :  { %289 = vmatpush.msra.mxu2 %v189_v41  ;;  %270 = vmatpush.msra.mxu1 %v218_v44  ;;  %v206_v4 = vld [vmem:[#allocation3 + $0x110] sm:$0xff]  ;;  %v175_v5 = vld [vmem:[#allocation3 + $0x18] sm:$0xff]  ;;  %v172_v7 = vld [vmem:[#allocation3] sm:$0xff] }
  0x20   :  { %309 = vmatpush.msra.mxu3 %v221_v42  ;;  %251 = vmatpush.msra.mxu0 %v184_v47  ;;  %v207_v6 = vld [vmem:[#allocation3 + $0x118] sm:$0xff]  ;;  %v204_v8 = vld [vmem:[#allocation3 + $0x100] sm:$0xff]  ;;  %v173_v9 = vld [vmem:[#allocation3 + $0x8] sm:$0xff] }
  0x21   :  { %290 = vmatpush.msra.mxu2 %v187_v45  ;;  %271 = vmatpush.msra.mxu1 %v216_v48  ;;  %v205_v10 = vld [vmem:[#allocation3 + $0x108] sm:$0xff]  ;;  %v339_v11 = vld [vmem:[%s646_s7 + $0x78] sm:$0xff]  ;;  %v336_v17 = vld [vmem:[%s646_s7 + $0x60] sm:$0xff] }
  0x22   :  { %310 = vmatpush.msra.mxu3 %v219_v46  ;;  %252 = vmatpush.msra.mxu0 %v182_v51  ;;  %v338_v12 = vld [vmem:[%s646_s7 + $0x70] sm:$0xff]  ;;  %v355_v13 = vld [vmem:[%s646_s7 + $0xf8] sm:$0xff]  ;;  %v337_v14 = vld [vmem:[%s646_s7 + $0x68] sm:$0xff] }
  0x23   :  { %291 = vmatpush.msra.mxu2 %v185_v49  ;;  %272 = vmatpush.msra.mxu1 %v214_v52  ;;  %v354_v15 = vld [vmem:[%s646_s7 + $0xf0] sm:$0xff]  ;;  %v353_v16 = vld [vmem:[%s646_s7 + $0xe8] sm:$0xff]  ;;  %v352_v18 = vld [vmem:[%s646_s7 + $0xe0] sm:$0xff] }
  0x24   :  { %311 = vmatpush.msra.mxu3 %v217_v50  ;;  %253 = vmatpush.msra.mxu0 %v180_v55  ;;  %v335_v19 = vld [vmem:[%s646_s7 + $0x58] sm:$0xff]  ;;  %v334_v21 = vld [vmem:[%s646_s7 + $0x50] sm:$0xff]  ;;  %v333_v23 = vld [vmem:[%s646_s7 + $0x48] sm:$0xff] }
  0x25   :  { %292 = vmatpush.msra.mxu2 %v183_v53  ;;  %273 = vmatpush.msra.mxu1 %v212_v56  ;;  %v351_v20 = vld [vmem:[%s646_s7 + $0xd8] sm:$0xff]  ;;  %v350_v22 = vld [vmem:[%s646_s7 + $0xd0] sm:$0xff]  ;;  %v349_v24 = vld [vmem:[%s646_s7 + $0xc8] sm:$0xff] }
  0x26   :  { %312 = vmatpush.msra.mxu3 %v215_v54  ;;  %254 = vmatpush.msra.mxu0 %v178_v59  ;;  %v332_v25 = vld [vmem:[%s646_s7 + $0x40] sm:$0xff]  ;;  %v331_v27 = vld [vmem:[%s646_s7 + $0x38] sm:$0xff]  ;;  %v330_v31 = vld [vmem:[%s646_s7 + $0x30] sm:$0xff] }
  0x27   :  { %293 = vmatpush.msra.mxu2 %v181_v57  ;;  %274 = vmatpush.msra.mxu1 %v210_v60  ;;  %v348_v26 = vld [vmem:[%s646_s7 + $0xc0] sm:$0xff]  ;;  %v347_v28 = vld [vmem:[%s646_s7 + $0xb8] sm:$0xff]  ;;  %v329_v32 = vld [vmem:[%s646_s7 + $0x28] sm:$0xff] }
  0x28   :  { %313 = vmatpush.msra.mxu3 %v213_v58  ;;  %255 = vmatpush.msra.mxu0 %v176_v63  ;;  %v162_v33 = vld [vmem:[%s643_s4] sm:$0x3]  ;;  %v327_v45 = vld [vmem:[%s646_s7 + $0x18] sm:$0xff]  ;;  %v346_v46 = vld [vmem:[%s646_s7 + $0xb0] sm:$0xff] }
  0x29   :  { %294 = vmatpush.msra.mxu2 %v179_v61  ;;  %275 = vmatpush.msra.mxu1 %v208_v0  ;;  %v328_v34 = vld [vmem:[%s646_s7 + $0x20] sm:$0xff]  ;;  %v164_v35 = vperm.slane %v162_v33, 0  ;;  %v165_v36 = vperm.slane %v162_v33, 1  ;;  %v326_v47 = vld [vmem:[%s646_s7 + $0x10] sm:$0xff]  ;;  %v345_v48 = vld [vmem:[%s646_s7 + $0xa8] sm:$0xff] }
  0x2a   :  { %314 = vmatpush.msra.mxu3 %v211_v62  ;;  %256 = vmatpush.msra.mxu0 %v174_v3  ;;  %v325_v49 = vld [vmem:[%s646_s7 + $0x8] sm:$0xff]  ;;  %v344_v50 = vld [vmem:[%s646_s7 + $0xa0] sm:$0xff]  ;;  %v343_v52 = vld [vmem:[%s646_s7 + $0x98] sm:$0xff] }
  0x2b   :  { %295 = vmatpush.msra.mxu2 %v177_v1  ;;  %276 = vmatpush.msra.mxu1 %v206_v4  ;;  %v324_v51 = vld [vmem:[%s646_s7] sm:$0xff]  ;;  %v342_v53 = vld [vmem:[%s646_s7 + $0x90] sm:$0xff]  ;;  %v341_v54 = vld [vmem:[%s646_s7 + $0x88] sm:$0xff] }
  0x2c   :  { %315 = vmatpush.msra.mxu3 %v209_v2  ;;  %257 = vmatpush.msra.mxu0 %v172_v7  ;;  %v340_v55 = vld [vmem:[%s646_s7 + $0x80] sm:$0xff] }
  0x2d   :  { %296 = vmatpush.msra.mxu2 %v175_v5  ;;  %277 = vmatpush.msra.mxu1 %v204_v8  ;;  %v236_v56 = vld [vmem:[%s645_s6] sm:$0x3] }
  0x2e   :  { %316 = vmatpush.msra.mxu3 %v207_v6  ;;  %360 = vmatpush.msrb.mxu0 %v339_v11  ;;  %v238_v57 = vperm.slane %v236_v56, 0  ;;  %v239_v62 = vperm.slane %v236_v56, 1  ;;  %v418_v5 = vld [vmem:[#allocation2] ss:$0 sm:$0xff] }
  0x2f   :  { %297 = vmatpush.msra.mxu2 %v173_v9  ;;  %380 = vmatpush.msrb.mxu1 %v355_v13 }
  0x30   :  { %317 = vmatpush.msra.mxu3 %v205_v10  ;;  %361 = vmatpush.msrb.mxu0 %v338_v12 }
  0x31   :  { %381 = vmatpush.msrb.mxu1 %v354_v15 }
  0x32   :  { %362 = vmatpush.msrb.mxu0 %v337_v14 }
  0x33   :  { %382 = vmatpush.msrb.mxu1 %v353_v16 }
  0x34   :  { %363 = vmatpush.msrb.mxu0 %v336_v17 }
  0x35   :  { %383 = vmatpush.msrb.mxu1 %v352_v18 }
  0x36   :  { %364 = vmatpush.msrb.mxu0 %v335_v19 }
  0x37   :  { %384 = vmatpush.msrb.mxu1 %v351_v20 }
  0x38   :  { %365 = vmatpush.msrb.mxu0 %v334_v21 }
  0x39   :  { %385 = vmatpush.msrb.mxu1 %v350_v22 }
  0x3a   :  { %366 = vmatpush.msrb.mxu0 %v333_v23 }
  0x3b   :  { %386 = vmatpush.msrb.mxu1 %v349_v24 }
  0x3c   :  { %367 = vmatpush.msrb.mxu0 %v332_v25 }
  0x3d   :  { %387 = vmatpush.msrb.mxu1 %v348_v26 }
  0x3e   :  { %368 = vmatpush.msrb.mxu0 %v331_v27 }
  0x3f   :  { %388 = vmatpush.msrb.mxu1 %v347_v28 }
  0x40   :  { %369 = vmatpush.msrb.mxu0 %v330_v31 }
  0x41   :  { %389 = vmatpush.msrb.mxu1 %v346_v46 }
  0x42   :  { %370 = vmatpush.msrb.mxu0 %v329_v32 }
  0x43   :  { %390 = vmatpush.msrb.mxu1 %v345_v48 }
  0x44   :  { %371 = vmatpush.msrb.mxu0 %v328_v34 }
  0x45   :  { %391 = vmatpush.msrb.mxu1 %v344_v50 }
  0x46   :  { %372 = vmatpush.msrb.mxu0 %v327_v45 }
  0x47   :  { %392 = vmatpush.msrb.mxu1 %v343_v52 }
  0x48   :  { %373 = vmatpush.msrb.mxu0 %v326_v47 }
  0x49   :  { %393 = vmatpush.msrb.mxu1 %v342_v53 }
  0x4a   :  { %374 = vmatpush.msrb.mxu0 %v325_v49 }
  0x4b   :  { %394 = vmatpush.msrb.mxu1 %v341_v54 }
  0x4c   :  { %375 = vmatpush.msrb.mxu0 %v324_v51 }
  0x4d   :  { %395 = vmatpush.msrb.mxu1 %v340_v55 }
  0x8d   :  { %v88_v29 = vpop.f32.mrf.mxu2 }
  0x8e   :  { %v108_v30 = vpop.f32.mrf.mxu3 }
  0x95   :  { %v139_v37 = vpop.f32.mrf.mxu2 }
  0x96   :  { %v159_v38 = vpop.f32.mrf.mxu3  ;;  %v140_v39 = vadd.f32 %v139_v37, %v88_v29 }
  0x97   :  { %v160_v40 = vadd.f32 %v159_v38, %v108_v30 }
  0x98   :  { %v168_v41 = vadd.f32 %v164_v35, %v140_v39 }
  0x99   :  { %v169_v42 = vadd.f32 %v165_v36, %v160_v40 }
  0x9a   :  { %v170_v43 = vmax.f32 %v168_v41, 0.0 }
  0x9b   :  { %v171_v44 = vmax.f32 %v169_v42, 0.0 }
  0x9c   :  { %258 = vmatmul.f32.vlgmr.msra.gmra.mxu0 %v170_v43  ;;  %298 = vmatmul.f32.vlgmr.msra.gmra.mxu2 %v170_v43 }
  0x9d   :  { %278 = vmatmul.f32.vlgmr.msra.gmra.mxu1 %v171_v44  ;;  %318 = vmatmul.f32.vlgmr.msra.gmra.mxu3 %v171_v44 }
 0x119   :  { %v259_v58 = vpop.f32.mrf.mxu0 }
 0x11a   :  { %v260_v59 = vadd.f32 %v259_v58, %v238_v57  ;;  %v279_v60 = vpop.f32.mrf.mxu1 }
 0x11c   :  { %v280_v61 = vadd.f32 %v279_v60, %v260_v59 }
 0x11e   :  { %v322_v63 = vmax.f32 %v280_v61, 0.0 }
 0x11f   :  { %v299_v0 = vpop.f32.mrf.mxu2 }
 0x120   :  { %376 = vmatmul.f32.vlgmr.msrb.gmra.mxu0 %v322_v63  ;;  %v300_v1 = vadd.f32 %v299_v0, %v239_v62  ;;  %v319_v2 = vpop.f32.mrf.mxu3 }
 0x122   :  { %v320_v3 = vadd.f32 %v319_v2, %v300_v1 }
 0x124   :  { %v323_v4 = vmax.f32 %v320_v3, 0.0 }
 0x126   :  { %396 = vmatmul.f32.vlgmr.msrb.gmra.mxu1 %v323_v4 }
 0x19d   :  { %v377_v6 = vpop.f32.mrf.mxu0 }
 0x19e   :  { %v378_v7 = vadd.f32 %v418_v5, %v377_v6 }
 0x1a3   :  { %v397_v8 = vpop.f32.mrf.mxu1 }
 0x1a4   :  { %v398_v9 = vadd.f32 %v397_v8, %v378_v7 }
 0x1a6   :  { %401 = vst.msk [vmem:[%s648_s9] sm:$0xff] %vm400_vm4, %v398_v9 }
 0x1a7   :  { %406 = vsyncpa [#allocation4], 1 }

</bundles_post_ra>
